<compile_context>
chip_gen: v7x
topology: tpu7x:2x2x1
jax: 0.10.0
libtpu: 0.0.40
codegen_flags: <defaults>
</compile_context>

<pallas_src>
import jax
import jax.numpy as jnp
from jax.experimental import pallas as pl
from jax.experimental.pallas import tpu as pltpu


def _round_up(n, m):
    return ((n + m - 1) // m) * m


def classifier_kernel(x_ref, w1_ref, b1_ref, w2_ref, b2_ref, o_ref):
    # First GEMM: [TB, D] @ [D, H] -> f32 accumulate on the MXU.
    h = jnp.dot(x_ref[...], w1_ref[...], preferred_element_type=jnp.float32)
    # Bias + ReLU in f32 on the VPU (one broadcast add per tile).
    h = jnp.maximum(h + b1_ref[...], 0.0)
    # Deliberate: activations take the second weight's dtype (bf16-safe);
    # the second GEMM still accumulates in f32.
    h = h.astype(w2_ref.dtype)
    out = jnp.dot(h, w2_ref[...], preferred_element_type=jnp.float32)
    o_ref[...] = (out + b2_ref[...]).astype(o_ref.dtype)


def classifier_forward(x, w1, b1, w2, b2, *, block_b=None):
    """y = relu(x @ w1 + b1) @ w2 + b2, fused in a single Pallas kernel."""
    B, D_in = x.shape
    H = w1.shape[1]
    C = w2.shape[1]

    # (1, H) / (1, C) views: pure metadata, no HBM traffic.
    b1_2d = b1.reshape(1, H)
    b2_2d = b2.reshape(1, C)

    # Adaptive batch tile: ~B/8 steps (>= 3-4 per TC on v7x megacore),
    # clamped to [128, 512], multiple of 8 for clean sublane tiling.
    if block_b is None:
        tb = _round_up(max(B // 8, 1), 8)
        tb = min(max(tb, 128), 512)
    else:
        tb = _round_up(block_b, 8)

    grid_b = pl.cdiv(B, tb)
    out_shape = jax.ShapeDtypeStruct((B, C), x.dtype)

    if grid_b == 1:
        # Whole problem fits one VMEM-resident block: no grid, no pipeline
        # prologue/epilogue, no double buffering, no padding, no post-slice.
        return pl.pallas_call(
            classifier_kernel,
            out_shape=out_shape,
        )(x, w1, b1_2d, w2, b2_2d)

    # Explicit VMEM budget: 3 x-tiles + 2 out-tiles + single-buffered weights,
    # with 2x headroom for the f32 intermediate and compiler scratch.
    x_item = jnp.dtype(x.dtype).itemsize
    w_item = jnp.dtype(w1.dtype).itemsize
    stream_bytes = 3 * tb * D_in * x_item + 2 * tb * C * x_item
    weight_bytes = (D_in * H + H) * w_item + (H * C + C) * w_item
    interm_bytes = tb * H * 4  # f32 hidden activations
    vmem_limit = int(min(64 * 1024 * 1024,
                         max(16 * 1024 * 1024,
                             2 * (stream_bytes + weight_bytes + interm_bytes))))

    # Batch-tiled, weight-resident path: x/out stream through the software
    # pipeline in (tb, full-feature) tiles; weights/biases use a constant
    # index_map + single buffering so they stay put in VMEM across steps.
    return pl.pallas_call(
        classifier_kernel,
        out_shape=out_shape,
        grid=(grid_b,),
        in_specs=[
            pl.BlockSpec((tb, D_in), lambda i: (i, 0),
                         pipeline_mode=pl.Buffered(3)),
            pl.BlockSpec((D_in, H), lambda i: (0, 0),
                         pipeline_mode=pl.Buffered(1)),
            pl.BlockSpec((1, H), lambda i: (0, 0),
                         pipeline_mode=pl.Buffered(1)),
            pl.BlockSpec((H, C), lambda i: (0, 0),
                         pipeline_mode=pl.Buffered(1)),
            pl.BlockSpec((1, C), lambda i: (0, 0),
                         pipeline_mode=pl.Buffered(1)),
        ],
        out_specs=pl.BlockSpec((tb, C), lambda i: (i, 0)),
        compiler_params=pltpu.CompilerParams(
            dimension_semantics=("parallel",),  # 2 TCs on v7x split the batch
            vmem_limit_bytes=vmem_limit,
        ),
    )(x, w1, b1_2d, w2, b2_2d)


def init_params(key, input_dim, hidden_dim, num_classes, dtype=jnp.float32):
    # Mimics nn.Linear's uniform(-1/sqrt(fan_in), 1/sqrt(fan_in)) init.
    k1, k2, k3, k4 = jax.random.split(key, 4)
    bound1 = 1.0 / (input_dim ** 0.5)
    bound2 = 1.0 / (hidden_dim ** 0.5)
    # Stored [in, out] (transpose of PyTorch's [out, in]) so kernel does x @ W.
    w1 = jax.random.uniform(k1, (input_dim, hidden_dim), dtype, -bound1, bound1)
    b1 = jax.random.uniform(k2, (hidden_dim,), dtype, -bound1, bound1)
    w2 = jax.random.uniform(k3, (hidden_dim, num_classes), dtype, -bound2, bound2)
    b2 = jax.random.uniform(k4, (num_classes,), dtype, -bound2, bound2)
    return w1, b1, w2, b2


def _reference(x, w1, b1, w2, b2):
    return jnp.maximum(x @ w1 + b1[None, :], 0.0) @ w2 + b2[None, :]


if __name__ == "__main__":
    input_dim, hidden_dim, num_classes = 32, 64, 10

    key = jax.random.PRNGKey(0)
    kx, kp, kx2 = jax.random.split(key, 3)
    w1, b1, w2, b2 = init_params(kp, input_dim, hidden_dim, num_classes)

    # Small batch: exercises the no-grid, single-VMEM-block fast path.
    x_small = jax.random.normal(kx, (4, input_dim), jnp.float32)
    out_small = jax.block_until_ready(classifier_forward(x_small, w1, b1, w2, b2))
    ref_small = _reference(x_small, w1, b1, w2, b2)
    assert out_small.shape == (4, num_classes)
    assert jnp.allclose(out_small, ref_small, atol=1e-5, rtol=1e-5)

    # Larger ragged batch (300 = 2*128 + 44): exercises the batch-tiled,
    # megacore-parallel pipeline path plus masked last-block writes.
    x_big = jax.random.normal(kx2, (300, input_dim), jnp.float32)
    out_big = jax.block_until_ready(classifier_forward(x_big, w1, b1, w2, b2))
    ref_big = _reference(x_big, w1, b1, w2, b2)
    assert out_big.shape == (300, num_classes)
    assert jnp.allclose(out_big, ref_big, atol=1e-5, rtol=1e-5)

    print("KERNEL_OK")
</pallas_src>

<mosaic_0001>
module attributes {stable_mosaic.version = 11 : i64} {
  func.func @classifier_kernel(%arg0: memref<4x32xf32, #tpu.memory_space<vmem>>, %arg1: memref<32x64xf32, #tpu.memory_space<vmem>>, %arg2: memref<1x64xf32, #tpu.memory_space<vmem>>, %arg3: memref<64x10xf32, #tpu.memory_space<vmem>>, %arg4: memref<1x10xf32, #tpu.memory_space<vmem>>, %arg5: memref<4x10xf32, #tpu.memory_space<vmem>>) attributes {dimension_semantics = [], scalar_prefetch = 0 : i64, scratch_operands = 0 : i64, tpu.core_type = #tpu.core_type<tc>} {
    %c0 = arith.constant 0 : index
    %c0_0 = arith.constant 0 : index
    %0 = vector.load %arg0[%c0, %c0_0] : memref<4x32xf32, #tpu.memory_space<vmem>>, vector<4x32xf32>
    %c0_1 = arith.constant 0 : index
    %c0_2 = arith.constant 0 : index
    %1 = vector.load %arg1[%c0_1, %c0_2] : memref<32x64xf32, #tpu.memory_space<vmem>>, vector<32x64xf32>
    %cst = arith.constant dense<0.000000e+00> : vector<4x64xf32>
    %2 = tpu.matmul %0, %1, %cst {dimension_numbers = #tpu.dot_dimension_numbers<[1], [0], [0], [1], [0, 0, 1, 1], [], []>} : vector<4x32xf32>, vector<32x64xf32>, vector<4x64xf32> -> vector<4x64xf32>
    %c0_3 = arith.constant 0 : index
    %c0_4 = arith.constant 0 : index
    %3 = vector.load %arg2[%c0_3, %c0_4] : memref<1x64xf32, #tpu.memory_space<vmem>>, vector<1x64xf32>
    %4 = vector.broadcast %3 : vector<1x64xf32> to vector<4x64xf32>
    %5 = arith.addf %2, %4 : vector<4x64xf32>
    %cst_5 = arith.constant 0.000000e+00 : f32
    %6 = vector.broadcast %cst_5 : f32 to vector<4x64xf32>
    %7 = arith.maximumf %5, %6 : vector<4x64xf32>
    %c0_6 = arith.constant 0 : index
    %c0_7 = arith.constant 0 : index
    %8 = vector.load %arg3[%c0_6, %c0_7] : memref<64x10xf32, #tpu.memory_space<vmem>>, vector<64x10xf32>
    %cst_8 = arith.constant dense<0.000000e+00> : vector<4x10xf32>
    %9 = tpu.matmul %7, %8, %cst_8 {dimension_numbers = #tpu.dot_dimension_numbers<[1], [0], [0], [1], [0, 0, 1, 1], [], []>} : vector<4x64xf32>, vector<64x10xf32>, vector<4x10xf32> -> vector<4x10xf32>
    %c0_9 = arith.constant 0 : index
    %c0_10 = arith.constant 0 : index
    %10 = vector.load %arg4[%c0_9, %c0_10] : memref<1x10xf32, #tpu.memory_space<vmem>>, vector<1x10xf32>
    %11 = vector.broadcast %10 : vector<1x10xf32> to vector<4x10xf32>
    %12 = arith.addf %9, %11 : vector<4x10xf32>
    %c0_11 = arith.constant 0 : index
    %c0_12 = arith.constant 0 : index
    %13 = vector.load %arg5[%c0_11, %c0_12] : memref<4x10xf32, #tpu.memory_space<vmem>>, vector<4x10xf32>
    tpu.vector_store %arg5[%c0_11, %c0_12], %12 {strides = array<i32>} : memref<4x10xf32, #tpu.memory_space<vmem>>, vector<4x10xf32>,
    return
  }
}

</mosaic_0001>

<bundles_post_ra>
// kernel: tpu_custom_call.1
= control target key start
LH: loop header
LB: loop body
LE: loop exit
PB: predicated region body
PF: predicated region fallthrough
CT: control target
= control target key end

     0   :  { %v307_v3 = vmov 0.0|0.0   ;;  %vm308_vm0 = vmmov 0   ;;  %v309_v6 = vmov 0.0   ;;  %s398_s0 = inlined_call_operand.vmem [shape: f32[4,32], index: 0, kind: input, shape index: {}]   ;;  %s399_s1 = inlined_call_operand.vmem [shape: f32[32,64], index: 1, kind: input, shape index: {}]   ;;  %s400_s2 = inlined_call_operand.vmem [shape: f32[1,64], index: 2, kind: input, shape index: {}]   ;;  %s401_s3 = inlined_call_operand.vmem [shape: f32[64,10], index: 3, kind: input, shape index: {}]   ;;  %s402_s4 = inlined_call_operand.vmem [shape: f32[1,10], index: 4, kind: input, shape index: {}]   ;;  %s403_s5 = inlined_call_operand.hbm [shape: f32[4,10], index: 5, kind: output, shape index: {}]  }
   0x1   :  { %v22_v0 = vld [vmem:[%s399_s1] sm:$0xff]  ;;  %v23_v1 = vld [vmem:[%s399_s1 + $0x8] sm:$0xff]  ;;  %v24_v2 = vld [vmem:[%s399_s1 + $0x10] sm:$0xff]  ;;  %261 = vmatprep.subr.bf16.mxu0 %v307_v3  ;;  %239 = vmatprep.mubr.msk.f32.mxu0 %vm308_vm0, %v309_v6 }
   0x2   :  { %v262_v4 = vpack.c.bf16 %v23_v1, %v22_v0  ;;  %v25_v5 = vld [vmem:[%s399_s1 + $0x18] sm:$0xff]  ;;  %v108_v7 = vld [vmem:[%s401_s3] sm:$0xff]  ;;  %267 = vmatprep.subr.bf16.mxu1 %v307_v3  ;;  %v109_v8 = vld [vmem:[%s401_s3 + $0x8] sm:$0xff]  ;;  %258 = vmatprep.mubr.msk.f32.mxu1 %vm308_vm0, %v309_v6 }
   0x3   :  { %v110_v9 = vld [vmem:[%s401_s3 + $0x10] sm:$0xff]  ;;  %v111_v10 = vld [vmem:[%s401_s3 + $0x18] sm:$0xff]  ;;  %v265_v11 = vpack.c.bf16 %v25_v5, %v24_v2  ;;  %v268_v12 = vpack.c.bf16 %v109_v8, %v108_v7 }
   0x4   :  { %263 = vmatpush3.bf16.msra.mxu0 %v262_v4 }
   0x5   :  { %264 = vmatprep.subr.bf16.mxu0 %v307_v3 }
   0x6   :  { %10 = vsyncpa [#allocation3], 0  ;;  %269 = vmatpush3.bf16.msra.mxu1 %v268_v12  ;;  %v271_v13 = vpack.c.bf16 %v111_v10, %v110_v9  ;;  %v112_v14 = vld [vmem:[%s401_s3 + $0x20] sm:$0xff]  ;;  %v113_v15 = vld [vmem:[%s401_s3 + $0x28] sm:$0xff]  ;;  %vm33_vm1 = vcmask 261120   ;;  %vm123_vm2 = vcmask 523264  }
   0x7   :  { %270 = vmatprep.subr.bf16.mxu1 %v307_v3  ;;  %v21_v16 = vld [vmem:[%s398_s0] sm:$0xf]  ;;  %v274_v17 = vpack.c.bf16 %v113_v15, %v112_v14  ;;  %v114_v18 = vld [vmem:[%s401_s3 + $0x30] sm:$0xff]  ;;  %v115_v19 = vld [vmem:[%s401_s3 + $0x38] sm:$0xff]  ;;  %s310_s21 = smov [#allocation2]   ;;  %vm197_vm3 = vcmask 76800  }
   0x8   :  { %266 = vmatpush3.bf16.msra.mxu0 %v265_v11  ;;  %v277_v20 = vpack.c.bf16 %v115_v19, %v114_v18  ;;  %v213_v21 = vld [vmem:[%s400_s2] ss:$0 sm:$0xff]  ;;  %s205_s22 = sshll.u32 %s310_s21, 4  ;;  %s206_s22 = int_to_ptr.vmem [resolvable:$true] %s205_s22 }
   0x9   :  { %v215_v26 = vld [vmem:[%s402_s4] ss:$0 sm:$0xff]  ;;  %s283_s3 = scalar_lea.vmem %s206_s22, 64  ;;  %p288_p1 = scmp.lt.s32.totalorder %s206_s22, %s206_s22 }
   0xa   :  { %272 = vmatpush3.bf16.msra.mxu1 %v271_v13  ;;  %p284_p0 = scmp.ne.s32.totalorder %s206_s22, %s283_s3  ;;  %p289_p2 = scmp.lt.s32.totalorder %s283_s3, %s283_s3 }
   0xb   :  { %240 = vmatmul.mubr.msk.f32.vlgmr.msra.gmra.mrb[0].mxu0 %vm33_vm1, %v21_v16  ;;  %273 = vmatprep.subr.bf16.mxu1 %v307_v3 }
   0xc   :  { %p290_p3 = por %p289_p2, %p288_p1 }
   0xe   :  { %275 = vmatpush3.bf16.msra.mxu1 %v274_v17  ;;  %p291_p4 = pnand %p290_p3, %p284_p0 }
   0xf   :  { %276 = vmatprep.subr.bf16.mxu1 %v307_v3 }
  0x12   :  { %278 = vmatpush3.bf16.msra.mxu1 %v277_v20 }
  0xde   :  { %v103_v22 = vpop.f32.mrb[0].mxu0 }
  0xdf   :  { %v104_v23 = vadd.f32 %v213_v21, %v103_v22  ;;  %v241_v24 = vpop.f32.mrb[1].mxu0 }
  0xe1   :  { %v107_v25 = vmax.f32 %v104_v23, 0.0 }
  0xe3   :  { %259 = vmatmul.mubr.msk.f32.vlgmr.msra.gmra.mrb[0].mxu1 %vm123_vm2, %v107_v25 }
 0x1b6   :  { %v193_v27 = vpop.f32.mrb[0].mxu1 }
 0x1b7   :  { %v194_v28 = vadd.f32 %v215_v26, %v193_v27  ;;  %v260_v29 = vpop.f32.mrb[1].mxu1 }
 0x1b9   :  { %198 = vst.msk [vmem:[#allocation2] sm:$0xf] %vm197_vm3, %v194_v28 }
 0x1ba   :  { %294 = shalt.err (!%p291_p4)
}
 0x1bb   :  { %s295_s24 = scalar_lea.hbm %s403_s5, 64 }
 0x1bc   :  { %p296_p5 = scmp.ne.s32.totalorder %s403_s5, %s295_s24  ;;  %p299_p6 = scmp.lt.u32.totalorder %s295_s24, %s403_s5 }
 0x1be   :  { %p301_p7 = pnand %p299_p6, %p296_p5 }
 0x1c0   :  { %304 = shalt.err (!%p301_p7)
}
 0x1c1   :  { %208 = dma.vmem_to_hbm [thread:$0]  %s206_s22, 64, %s403_s5, [#allocation3]  }
 0x1c2   :  { %305 = dma.done.wait [#allocation3], 64  }
 0x1c3   :  { %306 = vsyncadd [#allocation3], 4294967232 }
 0x1c4   :  { %212 = vsyncpa [#allocation3], 1 }

</bundles_post_ra>
